<compile_context>
chip_gen: v7x
topology: tpu7x:2x2x1
jax: 0.10.0
libtpu: 0.0.40
codegen_flags: <defaults>
</compile_context>

<pallas_src>
import jax
import jax.numpy as jnp
from jax.experimental import pallas as pl
from jax.experimental.pallas import tpu as pltpu

INPUT_DIM = 32    # "input_dim" of the VAE
H1 = 400          # hidden width of fc1 / fc3 (fixed by the module)
LATENT = 20       # latent dim of fc21 / fc22 / fc3 (fixed by the module)

LANE = 128


def _round_up(n, m):
    return ((n + m - 1) // m) * m


D_PAD = _round_up(INPUT_DIM, LANE)   # 128
H_PAD = _round_up(H1, LANE)          # 512
L_PAD = _round_up(LATENT, LANE)      # 128
OUT_W = D_PAD + 2 * L_PAD            # 384 : [recon_pad | mu_pad | logvar_pad]


def vae_kernel(x_ref, eps_ref,
               w1_ref, b1_ref, wenc_ref, benc_ref,
               w3_ref, b3_ref, w4_ref, b4_ref,
               out_ref):
    bf16 = jnp.bfloat16

    x = x_ref[...].astype(bf16)                       # (tb, D_PAD)
    eps = eps_ref[...]                                # (tb, L_PAD), f32, padded lanes = 0

    # ----- encode: fc1 + ReLU -----
    h1 = jnp.dot(x, w1_ref[...],
                 preferred_element_type=jnp.float32) + b1_ref[...]
    h1 = jnp.maximum(h1, 0.0)                         # (tb, H_PAD), padded lanes stay 0

    # ----- fused fc21|fc22 head: one (H_PAD, 2*L_PAD) matmul -----
    y = jnp.dot(h1.astype(bf16), wenc_ref[...],
                preferred_element_type=jnp.float32) + benc_ref[...]
    mu = y[:, :L_PAD]                                 # (tb, L_PAD)
    logvar = y[:, L_PAD:]                             # (tb, L_PAD)

    # ----- reparameterize (eps supplied from host for determinism) -----
    std = jnp.exp(0.5 * logvar)                       # padded lanes: exp(0) = 1
    z = mu + eps * std                                # padded lanes: 0 + 0*1 = 0

    # ----- decode: fc3 + ReLU, fc4 -----
    h3 = jnp.dot(z.astype(bf16), w3_ref[...],
                 preferred_element_type=jnp.float32) + b3_ref[...]
    h3 = jnp.maximum(h3, 0.0)
    recon = jnp.dot(h3.astype(bf16), w4_ref[...],
                    preferred_element_type=jnp.float32) + b4_ref[...]

    # single lane-dense (tb, 384) output slab; all slices are 128-aligned -> unmasked vst
    out_ref[:, 0:D_PAD] = recon
    out_ref[:, D_PAD:D_PAD + L_PAD] = mu
    out_ref[:, D_PAD + L_PAD:OUT_W] = logvar


def _pad2(a, rows, cols):
    return jnp.pad(a, ((0, rows - a.shape[0]), (0, cols - a.shape[1])))


def prepare_kernel_params(params):
    """Zero-pad to lane-aligned shapes, fuse fc21|fc22, cast weights to bf16."""
    w1, b1, w21, b21, w22, b22, w3, b3, w4, b4 = params
    bf16 = jnp.bfloat16
    w1_p = _pad2(w1, D_PAD, H_PAD).astype(bf16)
    b1_p = _pad2(b1, 1, H_PAD)
    wenc = jnp.concatenate(
        [_pad2(w21, H_PAD, L_PAD), _pad2(w22, H_PAD, L_PAD)], axis=1).astype(bf16)
    benc = jnp.concatenate([_pad2(b21, 1, L_PAD), _pad2(b22, 1, L_PAD)], axis=1)
    w3_p = _pad2(w3, L_PAD, H_PAD).astype(bf16)
    b3_p = _pad2(b3, 1, H_PAD)
    w4_p = _pad2(w4, H_PAD, D_PAD).astype(bf16)
    b4_p = _pad2(b4, 1, D_PAD)
    return (w1_p, b1_p, wenc, benc, w3_p, b3_p, w4_p, b4_p)


def vae_forward(x, eps, params, *, tb=None):
    """x: (B, INPUT_DIM) f32, eps: (B, LATENT) f32. Returns (recon, mu, logvar)."""
    B, D = x.shape
    assert D == INPUT_DIM and eps.shape == (B, LATENT)

    # Big batch tiles; for small B this collapses to grid=(1,) with the whole batch
    # resident in VMEM (working set ~1 MB << VMEM on v5e/v6e/v7x).
    b_pad = _round_up(max(B, 8), 8)
    if tb is None:
        tb = min(b_pad, 512)
    b_pad = _round_up(b_pad, tb)
    grid = (b_pad // tb,)

    x_p = _pad2(x.astype(jnp.float32), b_pad, D_PAD)
    eps_p = _pad2(eps.astype(jnp.float32), b_pad, L_PAD)
    kp = prepare_kernel_params(params)

    def batch_spec(cols):
        return pl.BlockSpec((tb, cols), lambda i: (i, 0))

    def full_spec(shape):
        return pl.BlockSpec(shape, lambda i: (0,) * len(shape))

    in_specs = [batch_spec(D_PAD), batch_spec(L_PAD)]
    in_specs += [full_spec(p.shape) for p in kp]

    out = pl.pallas_call(
        vae_kernel,
        out_shape=jax.ShapeDtypeStruct((b_pad, OUT_W), jnp.float32),
        grid_spec=pltpu.PrefetchScalarGridSpec(
            num_scalar_prefetch=0,
            grid=grid,
            in_specs=in_specs,
            out_specs=batch_spec(OUT_W),
        ),
        compiler_params=pltpu.CompilerParams(
            dimension_semantics=("parallel",),
        ),
    )(x_p, eps_p, *kp)

    recon = out[:B, 0:INPUT_DIM]
    mu = out[:B, D_PAD:D_PAD + LATENT]
    logvar = out[:B, D_PAD + L_PAD:D_PAD + L_PAD + LATENT]
    return recon, mu, logvar


def init_params(key, input_dim):
    """Deterministic init mirroring nn.Linear shapes.

    PyTorch stores Linear weights as (out, in); we store the transpose (in, out)
    so the kernel does x @ W. Biases are kept 2D (1, out) for TPU.
    """
    def linear(key, fan_in, fan_out):
        kw, kb = jax.random.split(key)
        bound = 1.0 / jnp.sqrt(fan_in)
        w = jax.random.uniform(kw, (fan_in, fan_out), jnp.float32, -bound, bound)
        b = jax.random.uniform(kb, (1, fan_out), jnp.float32, -bound, bound)
        return w, b

    k1, k21, k22, k3, k4 = jax.random.split(key, 5)
    w1, b1 = linear(k1, input_dim, H1)      # fc1
    w21, b21 = linear(k21, H1, LATENT)      # fc21
    w22, b22 = linear(k22, H1, LATENT)      # fc22
    w3, b3 = linear(k3, LATENT, H1)         # fc3
    w4, b4 = linear(k4, H1, input_dim)      # fc4
    return (w1, b1, w21, b21, w22, b22, w3, b3, w4, b4)


def reference_forward(x, eps, params):
    """Plain-JAX reference using the same bf16-weight / f32-accumulate math."""
    w1, b1, w21, b21, w22, b22, w3, b3, w4, b4 = params
    bf16 = jnp.bfloat16

    def mm(a, w):
        return jnp.dot(a.astype(bf16), w.astype(bf16),
                       preferred_element_type=jnp.float32)

    h1 = jax.nn.relu(mm(x, w1) + b1)
    mu = mm(h1, w21) + b21
    logvar = mm(h1, w22) + b22
    z = mu + eps * jnp.exp(0.5 * logvar)
    h3 = jax.nn.relu(mm(z, w3) + b3)
    return mm(h3, w4) + b4, mu, logvar


if __name__ == "__main__":
    key = jax.random.PRNGKey(0)
    kp, kx, keps = jax.random.split(key, 3)

    B = 16
    params = init_params(kp, INPUT_DIM)
    x = jax.random.normal(kx, (B, INPUT_DIM), jnp.float32)
    # eps plays the role of torch.randn_like(std) in reparameterize
    eps = jax.random.normal(keps, (B, LATENT), jnp.float32)

    recon, mu, logvar = vae_forward(x, eps, params)
    jax.block_until_ready((recon, mu, logvar))

    # sanity check against plain-JAX reference (same bf16 weight precision)
    r_ref, m_ref, lv_ref = reference_forward(x, eps, params)
    assert jnp.allclose(recon, r_ref, atol=1e-2, rtol=1e-2)
    assert jnp.allclose(mu, m_ref, atol=1e-2, rtol=1e-2)
    assert jnp.allclose(logvar, lv_ref, atol=1e-2, rtol=1e-2)

    print("KERNEL_OK")
</pallas_src>

<mosaic_0001>
module attributes {stable_mosaic.version = 11 : i64} {
  func.func @vae_kernel(%arg0: i32, %arg1: memref<16x128xf32, #tpu.memory_space<vmem>>, %arg2: memref<16x128xf32, #tpu.memory_space<vmem>>, %arg3: memref<128x512xbf16, #tpu.memory_space<vmem>>, %arg4: memref<1x512xf32, #tpu.memory_space<vmem>>, %arg5: memref<512x256xbf16, #tpu.memory_space<vmem>>, %arg6: memref<1x256xf32, #tpu.memory_space<vmem>>, %arg7: memref<128x512xbf16, #tpu.memory_space<vmem>>, %arg8: memref<1x512xf32, #tpu.memory_space<vmem>>, %arg9: memref<512x128xbf16, #tpu.memory_space<vmem>>, %arg10: memref<1x128xf32, #tpu.memory_space<vmem>>, %arg11: memref<16x384xf32, #tpu.memory_space<vmem>>) attributes {dimension_semantics = [#tpu.dimension_semantics<parallel>], iteration_bounds = array<i64: 1>, scalar_prefetch = 0 : i64, scratch_operands = 0 : i64, tpu.core_type = #tpu.core_type<tc>, window_params = [{transform_indices = @transform_0, window_bounds = array<i64: 16, 128>}, {transform_indices = @transform_1, window_bounds = array<i64: 16, 128>}, {pipeline_mode = #tpu.pipeline_mode<synchronous>, transform_indices = @transform_2, window_bounds = array<i64: 128, 512>}, {pipeline_mode = #tpu.pipeline_mode<synchronous>, transform_indices = @transform_3, window_bounds = array<i64: 1, 512>}, {pipeline_mode = #tpu.pipeline_mode<synchronous>, transform_indices = @transform_4, window_bounds = array<i64: 512, 256>}, {pipeline_mode = #tpu.pipeline_mode<synchronous>, transform_indices = @transform_5, window_bounds = array<i64: 1, 256>}, {pipeline_mode = #tpu.pipeline_mode<synchronous>, transform_indices = @transform_6, window_bounds = array<i64: 128, 512>}, {pipeline_mode = #tpu.pipeline_mode<synchronous>, transform_indices = @transform_7, window_bounds = array<i64: 1, 512>}, {pipeline_mode = #tpu.pipeline_mode<synchronous>, transform_indices = @transform_8, window_bounds = array<i64: 512, 128>}, {pipeline_mode = #tpu.pipeline_mode<synchronous>, transform_indices = @transform_9, window_bounds = array<i64: 1, 128>}, {transform_indices = @transform_10, window_bounds = array<i64: 16, 384>}]} {
    %c0 = arith.constant 0 : index
    %c0_0 = arith.constant 0 : index
    %0 = vector.load %arg1[%c0, %c0_0] : memref<16x128xf32, #tpu.memory_space<vmem>>, vector<16x128xf32>
    %1 = arith.truncf %0 : vector<16x128xf32> to vector<16x128xbf16>
    %c0_1 = arith.constant 0 : index
    %c0_2 = arith.constant 0 : index
    %2 = vector.load %arg2[%c0_1, %c0_2] : memref<16x128xf32, #tpu.memory_space<vmem>>, vector<16x128xf32>
    %c0_3 = arith.constant 0 : index
    %c0_4 = arith.constant 0 : index
    %3 = vector.load %arg3[%c0_3, %c0_4] : memref<128x512xbf16, #tpu.memory_space<vmem>>, vector<128x512xbf16>
    %cst = arith.constant dense<0.000000e+00> : vector<16x512xf32>
    %4 = tpu.matmul %1, %3, %cst {dimension_numbers = #tpu.dot_dimension_numbers<[1], [0], [0], [1], [0, 0, 1, 1], [], []>} : vector<16x128xbf16>, vector<128x512xbf16>, vector<16x512xf32> -> vector<16x512xf32>
    %c0_5 = arith.constant 0 : index
    %c0_6 = arith.constant 0 : index
    %5 = vector.load %arg4[%c0_5, %c0_6] : memref<1x512xf32, #tpu.memory_space<vmem>>, vector<1x512xf32>
    %6 = vector.broadcast %5 : vector<1x512xf32> to vector<16x512xf32>
    %7 = arith.addf %4, %6 : vector<16x512xf32>
    %cst_7 = arith.constant 0.000000e+00 : f32
    %8 = vector.broadcast %cst_7 : f32 to vector<16x512xf32>
    %9 = arith.maximumf %7, %8 : vector<16x512xf32>
    %10 = arith.truncf %9 : vector<16x512xf32> to vector<16x512xbf16>
    %c0_8 = arith.constant 0 : index
    %c0_9 = arith.constant 0 : index
    %11 = vector.load %arg5[%c0_8, %c0_9] : memref<512x256xbf16, #tpu.memory_space<vmem>>, vector<512x256xbf16>
    %cst_10 = arith.constant dense<0.000000e+00> : vector<16x256xf32>
    %12 = tpu.matmul %10, %11, %cst_10 {dimension_numbers = #tpu.dot_dimension_numbers<[1], [0], [0], [1], [0, 0, 1, 1], [], []>} : vector<16x512xbf16>, vector<512x256xbf16>, vector<16x256xf32> -> vector<16x256xf32>
    %c0_11 = arith.constant 0 : index
    %c0_12 = arith.constant 0 : index
    %13 = vector.load %arg6[%c0_11, %c0_12] : memref<1x256xf32, #tpu.memory_space<vmem>>, vector<1x256xf32>
    %14 = vector.broadcast %13 : vector<1x256xf32> to vector<16x256xf32>
    %15 = arith.addf %12, %14 : vector<16x256xf32>
    %16 = vector.extract_strided_slice %15 {offsets = [0, 0], sizes = [16, 128], strides = [1, 1]} : vector<16x256xf32> to vector<16x128xf32>
    %17 = vector.extract_strided_slice %15 {offsets = [0, 128], sizes = [16, 128], strides = [1, 1]} : vector<16x256xf32> to vector<16x128xf32>
    %cst_13 = arith.constant 5.000000e-01 : f32
    %18 = vector.broadcast %cst_13 : f32 to vector<16x128xf32>
    %19 = arith.mulf %18, %17 : vector<16x128xf32>
    %20 = math.exp %19 : vector<16x128xf32>
    %21 = arith.mulf %2, %20 : vector<16x128xf32>
    %22 = arith.addf %16, %21 : vector<16x128xf32>
    %23 = arith.truncf %22 : vector<16x128xf32> to vector<16x128xbf16>
    %c0_14 = arith.constant 0 : index
    %c0_15 = arith.constant 0 : index
    %24 = vector.load %arg7[%c0_14, %c0_15] : memref<128x512xbf16, #tpu.memory_space<vmem>>, vector<128x512xbf16>
    %cst_16 = arith.constant dense<0.000000e+00> : vector<16x512xf32>
    %25 = tpu.matmul %23, %24, %cst_16 {dimension_numbers = #tpu.dot_dimension_numbers<[1], [0], [0], [1], [0, 0, 1, 1], [], []>} : vector<16x128xbf16>, vector<128x512xbf16>, vector<16x512xf32> -> vector<16x512xf32>
    %c0_17 = arith.constant 0 : index
    %c0_18 = arith.constant 0 : index
    %26 = vector.load %arg8[%c0_17, %c0_18] : memref<1x512xf32, #tpu.memory_space<vmem>>, vector<1x512xf32>
    %27 = vector.broadcast %26 : vector<1x512xf32> to vector<16x512xf32>
    %28 = arith.addf %25, %27 : vector<16x512xf32>
    %cst_19 = arith.constant 0.000000e+00 : f32
    %29 = vector.broadcast %cst_19 : f32 to vector<16x512xf32>
    %30 = arith.maximumf %28, %29 : vector<16x512xf32>
    %31 = arith.truncf %30 : vector<16x512xf32> to vector<16x512xbf16>
    %c0_20 = arith.constant 0 : index
    %c0_21 = arith.constant 0 : index
    %32 = vector.load %arg9[%c0_20, %c0_21] : memref<512x128xbf16, #tpu.memory_space<vmem>>, vector<512x128xbf16>
    %cst_22 = arith.constant dense<0.000000e+00> : vector<16x128xf32>
    %33 = tpu.matmul %31, %32, %cst_22 {dimension_numbers = #tpu.dot_dimension_numbers<[1], [0], [0], [1], [0, 0, 1, 1], [], []>} : vector<16x512xbf16>, vector<512x128xbf16>, vector<16x128xf32> -> vector<16x128xf32>
    %c0_23 = arith.constant 0 : index
    %c0_24 = arith.constant 0 : index
    %34 = vector.load %arg10[%c0_23, %c0_24] : memref<1x128xf32, #tpu.memory_space<vmem>>, vector<1x128xf32>
    %35 = vector.broadcast %34 : vector<1x128xf32> to vector<16x128xf32>
    %36 = arith.addf %33, %35 : vector<16x128xf32>
    %c0_25 = arith.constant 0 : index
    %c0_26 = arith.constant 0 : index
    %37 = vector.load %arg11[%c0_25, %c0_26] : memref<16x384xf32, #tpu.memory_space<vmem>>, vector<16x128xf32>
    tpu.vector_store %arg11[%c0_25, %c0_26], %36 {strides = array<i32>} : memref<16x384xf32, #tpu.memory_space<vmem>>, vector<16x128xf32>,
    %c0_27 = arith.constant 0 : index
    %c128 = arith.constant 128 : index
    %38 = vector.load %arg11[%c0_27, %c128] : memref<16x384xf32, #tpu.memory_space<vmem>>, vector<16x128xf32>
    tpu.vector_store %arg11[%c0_27, %c128], %16 {strides = array<i32>} : memref<16x384xf32, #tpu.memory_space<vmem>>, vector<16x128xf32>,
    %c0_28 = arith.constant 0 : index
    %c256 = arith.constant 256 : index
    %39 = vector.load %arg11[%c0_28, %c256] : memref<16x384xf32, #tpu.memory_space<vmem>>, vector<16x128xf32>
    tpu.vector_store %arg11[%c0_28, %c256], %17 {strides = array<i32>} : memref<16x384xf32, #tpu.memory_space<vmem>>, vector<16x128xf32>,
    return
  }
  func.func @transform_0(%arg0: i32) -> (i32, i32) {
    %c0_i32 = arith.constant 0 : i32
    %c0_i32_0 = arith.constant 0 : i32
    return %arg0, %c0_i32 : i32, i32
  }
  func.func @transform_1(%arg0: i32) -> (i32, i32) {
    %c0_i32 = arith.constant 0 : i32
    %c0_i32_0 = arith.constant 0 : i32
    return %arg0, %c0_i32 : i32, i32
  }
  func.func @transform_2(%arg0: i32) -> (i32, i32) {
    %c0_i32 = arith.constant 0 : i32
    %c0_i32_0 = arith.constant 0 : i32
    %c0_i32_1 = arith.constant 0 : i32
    return %c0_i32, %c0_i32_0 : i32, i32
  }
  func.func @transform_3(%arg0: i32) -> (i32, i32) {
    %c0_i32 = arith.constant 0 : i32
    %c0_i32_0 = arith.constant 0 : i32
    %c0_i32_1 = arith.constant 0 : i32
    return %c0_i32, %c0_i32_0 : i32, i32
  }
  func.func @transform_4(%arg0: i32) -> (i32, i32) {
    %c0_i32 = arith.constant 0 : i32
    %c0_i32_0 = arith.constant 0 : i32
    %c0_i32_1 = arith.constant 0 : i32
    return %c0_i32, %c0_i32_0 : i32, i32
  }
  func.func @transform_5(%arg0: i32) -> (i32, i32) {
    %c0_i32 = arith.constant 0 : i32
    %c0_i32_0 = arith.constant 0 : i32
    %c0_i32_1 = arith.constant 0 : i32
    return %c0_i32, %c0_i32_0 : i32, i32
  }
  func.func @transform_6(%arg0: i32) -> (i32, i32) {
    %c0_i32 = arith.constant 0 : i32
    %c0_i32_0 = arith.constant 0 : i32
    %c0_i32_1 = arith.constant 0 : i32
    return %c0_i32, %c0_i32_0 : i32, i32
  }
  func.func @transform_7(%arg0: i32) -> (i32, i32) {
    %c0_i32 = arith.constant 0 : i32
    %c0_i32_0 = arith.constant 0 : i32
    %c0_i32_1 = arith.constant 0 : i32
    return %c0_i32, %c0_i32_0 : i32, i32
  }
  func.func @transform_8(%arg0: i32) -> (i32, i32) {
    %c0_i32 = arith.constant 0 : i32
    %c0_i32_0 = arith.constant 0 : i32
    %c0_i32_1 = arith.constant 0 : i32
    return %c0_i32, %c0_i32_0 : i32, i32
  }
  func.func @transform_9(%arg0: i32) -> (i32, i32) {
    %c0_i32 = arith.constant 0 : i32
    %c0_i32_0 = arith.constant 0 : i32
    %c0_i32_1 = arith.constant 0 : i32
    return %c0_i32, %c0_i32_0 : i32, i32
  }
  func.func @transform_10(%arg0: i32) -> (i32, i32) {
    %c0_i32 = arith.constant 0 : i32
    %c0_i32_0 = arith.constant 0 : i32
    return %arg0, %c0_i32 : i32, i32
  }
}

</mosaic_0001>

<bundles_post_ra>
// kernel: tpu_custom_call.1
= control target key start
LH: loop header
LB: loop body
LE: loop exit
PB: predicated region body
PF: predicated region fallthrough
CT: control target
= control target key end

     0   :  { %15 = vsyncpa [#allocation3], 0  ;;  %s2458_s0 = inlined_call_operand.hbm [shape: f32[16,128], index: 0, kind: input, shape index: {}]   ;;  %s2459_s1 = inlined_call_operand.hbm [shape: f32[16,128], index: 1, kind: input, shape index: {}]   ;;  %s2460_s2 = inlined_call_operand.hbm [shape: bf16[128,512], index: 2, kind: input, shape index: {}]   ;;  %s2461_s3 = inlined_call_operand.vmem [shape: f32[1,512], index: 3, kind: input, shape index: {}]   ;;  %s2462_s4 = inlined_call_operand.hbm [shape: bf16[512,256], index: 4, kind: input, shape index: {}]   ;;  %s2463_s5 = inlined_call_operand.vmem [shape: f32[1,256], index: 5, kind: input, shape index: {}]   ;;  %s2464_s6 = inlined_call_operand.hbm [shape: bf16[128,512], index: 6, kind: input, shape index: {}]   ;;  %s2465_s7 = inlined_call_operand.vmem [shape: f32[1,512], index: 7, kind: input, shape index: {}]   ;;  %s2466_s8 = inlined_call_operand.hbm [shape: bf16[512,128], index: 8, kind: input, shape index: {}]   ;;  %s2467_s9 = inlined_call_operand.vmem [shape: f32[1,128], index: 9, kind: input, shape index: {}]   ;;  %s2468_s10 = inlined_call_operand.hbm [shape: f32[16,384], index: 10, kind: output, shape index: {}]  }
   0x1   :  { %16 = vsyncpa [#allocation6], 0 }
   0x2   :  { %17 = vsyncpa [#allocation9], 0 }
   0x3   :  { %18 = vsyncpa [#allocation12], 0 }
   0x4   :  { %19 = vsyncpa [#allocation4], 0  ;;  %s2233_s13 = smov [#allocation5]   ;;  %s2234_s15 = smov [#allocation8]  }
   0x5   :  { %s37_s14 = sshll.u32 %s2233_s13, 4  ;;  %s63_s16 = sshll.u32 %s2234_s15, 4  ;;  %s38_s14 = int_to_ptr.vmem [resolvable:$true] %s37_s14  ;;  %s2304_s16 = int_to_ptr.vmem [resolvable:$true] %s63_s16 }
   0x6   :  { %s2069_s19 = scalar_lea.hbm %s2459_s1, 256 }
   0x7   :  { %p2070_p0 = scmp.ne.s32.totalorder %s2459_s1, %s2069_s19  ;;  %p2073_p1 = scmp.lt.u32.totalorder %s2069_s19, %s2459_s1 }
   0x9   :  { %p2075_p2 = pnand %p2073_p1, %p2070_p0 }
   0xb   :  { %2078 = shalt.err (!%p2075_p2)
}
   0xc   :  { %s2079_s24 = scalar_lea.vmem %s38_s14, 256  ;;  %p2084_p4 = scmp.lt.s32.totalorder %s38_s14, %s38_s14 }
   0xd   :  { %p2080_p3 = scmp.ne.s32.totalorder %s38_s14, %s2079_s24  ;;  %p2085_p5 = scmp.lt.s32.totalorder %s2079_s24, %s2079_s24 }
   0xf   :  { %p2086_p6 = por %p2085_p5, %p2084_p4 }
  0x11   :  { %p2087_p7 = pnand %p2086_p6, %p2080_p3 }
  0x13   :  { %2090 = shalt.err (!%p2087_p7)
}
  0x14   :  { %s2235_s25 = smov 128   ;;  %s2236_s26 = smov 8  }
  0x15   :  { %43 = dma.hbm_to_vmem [thread:$0]  %s2459_s1, 256, %s38_s14, [#allocation6], %s2235_s25, %s2235_s25, %s2236_s26  }
  0x16   :  { %s2091_s11 = scalar_lea.hbm %s2462_s4, 8192 }
  0x17   :  { %p2092_p8 = scmp.ne.s32.totalorder %s2462_s4, %s2091_s11  ;;  %p2095_p9 = scmp.lt.u32.totalorder %s2091_s11, %s2462_s4 }
  0x19   :  { %p2097_p10 = pnand %p2095_p9, %p2092_p8 }
  0x1b   :  { %2100 = shalt.err (!%p2097_p10)
}
  0x1c   :  { %s2101_s18 = scalar_lea.vmem %s2304_s16, 8192  ;;  %p2106_p12 = scmp.lt.s32.totalorder %s2304_s16, %s2304_s16 }
  0x1d   :  { %p2102_p11 = scmp.ne.s32.totalorder %s2304_s16, %s2101_s18  ;;  %p2107_p13 = scmp.lt.s32.totalorder %s2101_s18, %s2101_s18 }
  0x1f   :  { %p2108_p0 = por %p2107_p13, %p2106_p12 }
  0x21   :  { %p2109_p1 = pnand %p2108_p0, %p2102_p11 }
  0x23   :  { %2112 = shalt.err (!%p2109_p1)
}
  0x24   :  { %69 = dma.hbm_to_vmem [thread:$0]  %s2462_s4, 8192, %s2304_s16, [#allocation9], %s2235_s25, %s2235_s25, %s2236_s26  }
  0x25   :  { %s2237_s19 = smov [#allocation2]   ;;  %s2238_s21 = smov [#allocation7]  }
  0x26   :  { %s25_s20 = sshll.u32 %s2237_s19, 4  ;;  %s49_s22 = sshll.u32 %s2238_s21, 4  ;;  %s26_s20 = int_to_ptr.vmem [resolvable:$true] %s25_s20  ;;  %s2341_s22 = int_to_ptr.vmem [resolvable:$true] %s49_s22 }
  0x27   :  { %s2113_s27 = scalar_lea.hbm %s2458_s0, 256 }
  0x28   :  { %p2114_p2 = scmp.ne.s32.totalorder %s2458_s0, %s2113_s27  ;;  %p2117_p3 = scmp.lt.u32.totalorder %s2113_s27, %s2458_s0 }
  0x2a   :  { %p2119_p4 = pnand %p2117_p3, %p2114_p2 }
  0x2c   :  { %2122 = shalt.err (!%p2119_p4)
}
  0x2d   :  { %s2123_s4 = scalar_lea.vmem %s26_s20, 256  ;;  %p2128_p6 = scmp.lt.s32.totalorder %s26_s20, %s26_s20 }
  0x2e   :  { %p2124_p5 = scmp.ne.s32.totalorder %s26_s20, %s2123_s4  ;;  %p2129_p7 = scmp.lt.s32.totalorder %s2123_s4, %s2123_s4 }
  0x30   :  { %p2130_p8 = por %p2129_p7, %p2128_p6 }
  0x32   :  { %p2131_p9 = pnand %p2130_p8, %p2124_p5 }
  0x34   :  { %2134 = shalt.err (!%p2131_p9)
}
  0x35   :  { %31 = dma.hbm_to_vmem [thread:$0]  %s2458_s0, 256, %s26_s20, [#allocation3], %s2235_s25, %s2235_s25, %s2236_s26  }
  0x36   :  { %s2135_s17 = scalar_lea.hbm %s2460_s2, 4096 }
  0x37   :  { %p2136_p10 = scmp.ne.s32.totalorder %s2460_s2, %s2135_s17  ;;  %p2139_p11 = scmp.lt.u32.totalorder %s2135_s17, %s2460_s2 }
  0x39   :  { %p2141_p12 = pnand %p2139_p11, %p2136_p10 }
  0x3b   :  { %2144 = shalt.err (!%p2141_p12)
}
  0x3c   :  { %s2145_s21 = scalar_lea.vmem %s2341_s22, 4096  ;;  %p2150_p0 = scmp.lt.s32.totalorder %s2341_s22, %s2341_s22 }
  0x3d   :  { %p2146_p13 = scmp.ne.s32.totalorder %s2341_s22, %s2145_s21  ;;  %p2151_p1 = scmp.lt.s32.totalorder %s2145_s21, %s2145_s21 }
  0x3f   :  { %p2152_p2 = por %p2151_p1, %p2150_p0 }
  0x41   :  { %p2153_p3 = pnand %p2152_p2, %p2146_p13 }
  0x43   :  { %2156 = shalt.err (!%p2153_p3)
}
  0x44   :  { %s2239_s0 = smov 256   ;;  %s2240_s25 = smov 16  }
  0x45   :  { %55 = dma.hbm_to_vmem [thread:$0]  %s2460_s2, 4096, %s2341_s22, [#allocation6], %s2239_s0, %s2239_s0, %s2240_s25  }
  0x46   :  { %s2241_s23 = smov [#allocation10]   ;;  %s2242_s27 = smov [#allocation11]  }
  0x47   :  { %s77_s24 = sshll.u32 %s2241_s23, 4  ;;  %s91_s28 = sshll.u32 %s2242_s27, 4  ;;  %s78_s24 = int_to_ptr.vmem [resolvable:$true] %s77_s24  ;;  %s2375_s28 = int_to_ptr.vmem [resolvable:$true] %s91_s28 }
  0x48   :  { %s2157_s11 = scalar_lea.hbm %s2464_s6, 4096 }
  0x49   :  { %p2158_p4 = scmp.ne.s32.totalorder %s2464_s6, %s2157_s11  ;;  %p2161_p5 = scmp.lt.u32.totalorder %s2157_s11, %s2464_s6 }
  0x4b   :  { %p2163_p6 = pnand %p2161_p5, %p2158_p4 }
  0x4d   :  { %2166 = shalt.err (!%p2163_p6)
}
  0x4e   :  { %s2167_s2 = scalar_lea.vmem %s78_s24, 4096  ;;  %p2172_p8 = scmp.lt.s32.totalorder %s78_s24, %s78_s24 }
  0x4f   :  { %p2168_p7 = scmp.ne.s32.totalorder %s78_s24, %s2167_s2  ;;  %p2173_p9 = scmp.lt.s32.totalorder %s2167_s2, %s2167_s2 }
  0x51   :  { %p2174_p10 = por %p2173_p9, %p2172_p8 }
  0x53   :  { %p2175_p11 = pnand %p2174_p10, %p2168_p7 }
  0x55   :  { %2178 = shalt.err (!%p2175_p11)
}
  0x56   :  { %83 = dma.hbm_to_vmem [thread:$0]  %s2464_s6, 4096, %s78_s24, [#allocation9], %s2239_s0, %s2239_s0, %s2240_s25  }
  0x57   :  { %s2179_s1 = scalar_lea.hbm %s2466_s8, 4096 }
  0x58   :  { %p2180_p12 = scmp.ne.s32.totalorder %s2466_s8, %s2179_s1  ;;  %p2183_p13 = scmp.lt.u32.totalorder %s2179_s1, %s2466_s8 }
  0x5a   :  { %p2185_p0 = pnand %p2183_p13, %p2180_p12 }
  0x5c   :  { %2188 = shalt.err (!%p2185_p0)
}
  0x5d   :  { %s2189_s20 = scalar_lea.vmem %s2375_s28, 4096  ;;  %p2194_p2 = scmp.lt.s32.totalorder %s2375_s28, %s2375_s28 }
  0x5e   :  { %p2190_p1 = scmp.ne.s32.totalorder %s2375_s28, %s2189_s20  ;;  %p2195_p3 = scmp.lt.s32.totalorder %s2189_s20, %s2189_s20 }
  0x60   :  { %p2196_p4 = por %p2195_p3, %p2194_p2 }
  0x62   :  { %p2197_p5 = pnand %p2196_p4, %p2190_p1 }
  0x64   :  { %2200 = shalt.err (!%p2197_p5)
}
  0x65   :  { %s2243_s6 = smov 64   ;;  %s2244_s0 = smov 4  }
  0x66   :  { %97 = dma.hbm_to_vmem [thread:$0]  %s2466_s8, 4096, %s2375_s28, [#allocation12], %s2243_s6, %s2243_s6, %s2244_s0  }
  0x67   :  { %2223 = dma.done.wait [#allocation3], 256  }
  0x68   :  { %2224 = vsyncadd [#allocation3], 4294967040 }
  0x69   :  { %2225 = dma.done.wait [#allocation6], 4352  }
  0x6a   :  { %2226 = vsyncadd [#allocation6], 4294962944 }
  0x6b   :  { %2227 = dma.done.wait [#allocation9], 12288  }
  0x6c   :  { %2228 = vsyncadd [#allocation9], 4294955008 }
  0x6d   :  { %2229 = dma.done.wait [#allocation12], 4096  }
  0x6e   :  { %2230 = vsyncadd [#allocation12], 4294963200  ;;  %v2245_v0 = vmov 0   ;;  %v1841_v1 = vld [vmem:[#allocation7 + $0x4] ss:$16 sps:$4 sm:$0xff]   ;;  %v120_v27 = vld [vmem:[#allocation2 + $0x8] sm:$0xff] }
  0x6f   :  { %370 = vmatprep.mubr.bf16.mxu0 %v2245_v0  ;;  %413 = vmatprep.mubr.bf16.mxu1 %v2245_v0  ;;  %v1843_v2 = vld [vmem:[#allocation7] ss:$16 sps:$4 sm:$0xff]   ;;  %v1844_v3 = vld [vmem:[#allocation7 + $0x24] ss:$16 sps:$4 sm:$0xff]   ;;  %v1865_v10 = vld [vmem:[#allocation7 + $0xc] ss:$16 sps:$4 sm:$0xff]  }
  0x70   :  { %338 = vmatprep.subr.bf16.mxu0 %v1841_v1  ;;  %v1846_v4 = vld [vmem:[#allocation7 + $0x20] ss:$16 sps:$4 sm:$0xff]   ;;  %v1847_v5 = vld [vmem:[#allocation7 + $0x44] ss:$16 sps:$4 sm:$0xff]   ;;  %v1867_v11 = vld [vmem:[#allocation7 + $0x8] ss:$16 sps:$4 sm:$0xff]   ;;  %381 = vmatprep.subr.bf16.mxu1 %v1865_v10  ;;  %v158_v10 = vlaneseq }
  0x71   :  { %339 = vmatpush1.bf16.msra.mxu0 %v1843_v2  ;;  %v1849_v6 = vld [vmem:[#allocation7 + $0x40] ss:$16 sps:$4 sm:$0xff]   ;;  %v1850_v7 = vld [vmem:[#allocation7 + $0x64] ss:$16 sps:$4 sm:$0xff]   ;;  %v1868_v12 = vld [vmem:[#allocation7 + $0x2c] ss:$16 sps:$4 sm:$0xff]   ;;  %382 = vmatpush1.bf16.msra.mxu1 %v1867_v11 }
  0x72   :  { %340 = vmatprep.subr.bf16.mxu0 %v1844_v3  ;;  %v1852_v8 = vld [vmem:[#allocation7 + $0x60] ss:$16 sps:$4 sm:$0xff]   ;;  %v1853_v9 = vld [vmem:[#allocation7 + $0x84] ss:$16 sps:$4 sm:$0xff]   ;;  %v1870_v14 = vld [vmem:[#allocation7 + $0x28] ss:$16 sps:$4 sm:$0xff]   ;;  %383 = vmatprep.subr.bf16.mxu1 %v1868_v12 }
  0x73   :  { %v1855_v13 = vld [vmem:[#allocation7 + $0x80] ss:$16 sps:$4 sm:$0xff]   ;;  %v1856_v15 = vld [vmem:[#allocation7 + $0xa4] ss:$16 sps:$4 sm:$0xff]   ;;  %v1871_v16 = vld [vmem:[#allocation7 + $0x4c] ss:$16 sps:$4 sm:$0xff]  }
  0x74   :  { %v1858_v17 = vld [vmem:[#allocation7 + $0xa0] ss:$16 sps:$4 sm:$0xff]   ;;  %v1873_v18 = vld [vmem:[#allocation7 + $0x48] ss:$16 sps:$4 sm:$0xff]   ;;  %v1859_v19 = vld [vmem:[#allocation7 + $0xc4] ss:$16 sps:$4 sm:$0xff]  }
  0x75   :  { %341 = vmatpush1.bf16.msra.mxu0 %v1846_v4  ;;  %384 = vmatpush1.bf16.msra.mxu1 %v1870_v14  ;;  %v1874_v20 = vld [vmem:[#allocation7 + $0x6c] ss:$16 sps:$4 sm:$0xff]   ;;  %v1861_v21 = vld [vmem:[#allocation7 + $0xc0] ss:$16 sps:$4 sm:$0xff]   ;;  %v1876_v22 = vld [vmem:[#allocation7 + $0x68] ss:$16 sps:$4 sm:$0xff]  }
  0x76   :  { %342 = vmatprep.subr.bf16.mxu0 %v1847_v5  ;;  %385 = vmatprep.subr.bf16.mxu1 %v1871_v16  ;;  %v1862_v23 = vld [vmem:[#allocation7 + $0xe4] ss:$16 sps:$4 sm:$0xff]   ;;  %v1877_v24 = vld [vmem:[#allocation7 + $0x8c] ss:$16 sps:$4 sm:$0xff]   ;;  %v1864_v25 = vld [vmem:[#allocation7 + $0xe0] ss:$16 sps:$4 sm:$0xff]  }
  0x77   :  { %v119_v26 = vld [vmem:[#allocation2] sm:$0xff]  ;;  %v1879_v28 = vld [vmem:[#allocation7 + $0x88] ss:$16 sps:$4 sm:$0xff]   ;;  %v1880_v29 = vld [vmem:[#allocation7 + $0xac] ss:$16 sps:$4 sm:$0xff]   ;;  %v2409_v11 = vshrl.u32 %v158_v10, 7 }
  0x78   :  { %v1891_v30 = vld [vmem:[#allocation8 + $0x4] ss:$8 sps:$4 sm:$0xff]   ;;  %v121_v31 = vpack.c.bf16 %v120_v27, %v119_v26  ;;  %v1882_v32 = vld [vmem:[#allocation7 + $0xa8] ss:$16 sps:$4 sm:$0xff]   ;;  %v1894_v35 = vld [vmem:[#allocation8 + $0x14] ss:$8 sps:$4 sm:$0xff]  }
  0x79   :  { %343 = vmatpush1.bf16.msra.mxu0 %v1849_v6  ;;  %386 = vmatpush1.bf16.msra.mxu1 %v1873_v18  ;;  %v1889_v33 = vld [vmem:[#allocation8] ss:$8 sps:$4 sm:$0xff]   ;;  %v1883_v34 = vld [vmem:[#allocation7 + $0xcc] ss:$16 sps:$4 sm:$0xff]   ;;  %v1892_v37 = vld [vmem:[#allocation8 + $0x10] ss:$8 sps:$4 sm:$0xff]  }
  0x7a   :  { %344 = vmatprep.subr.bf16.mxu0 %v1850_v7  ;;  %387 = vmatprep.subr.bf16.mxu1 %v1874_v20  ;;  %v1885_v36 = vld [vmem:[#allocation7 + $0xc8] ss:$16 sps:$4 sm:$0xff]   ;;  %v1886_v38 = vld [vmem:[#allocation7 + $0xec] ss:$16 sps:$4 sm:$0xff]   ;;  %v1985_v6 = vld [vmem:[#allocation10] ss:$16 sps:$4 sm:$0xff]  }
  0x7b   :  { %v1897_v39 = vld [vmem:[#allocation8 + $0x24] ss:$8 sps:$4 sm:$0xff]   ;;  %v1888_v40 = vld [vmem:[#allocation7 + $0xe8] ss:$16 sps:$4 sm:$0xff]   ;;  %v1900_v42 = vld [vmem:[#allocation8 + $0x34] ss:$8 sps:$4 sm:$0xff]  }
  0x7c   :  { %v1895_v41 = vld [vmem:[#allocation8 + $0x20] ss:$8 sps:$4 sm:$0xff]   ;;  %v1898_v43 = vld [vmem:[#allocation8 + $0x30] ss:$8 sps:$4 sm:$0xff]   ;;  %v1903_v44 = vld [vmem:[#allocation8 + $0x44] ss:$8 sps:$4 sm:$0xff]  }
  0x7d   :  { %345 = vmatpush1.bf16.msra.mxu0 %v1852_v8  ;;  %388 = vmatpush1.bf16.msra.mxu1 %v1876_v22  ;;  %v1901_v45 = vld [vmem:[#allocation8 + $0x40] ss:$8 sps:$4 sm:$0xff]   ;;  %v1906_v46 = vld [vmem:[#allocation8 + $0x54] ss:$8 sps:$4 sm:$0xff]   ;;  %v1904_v47 = vld [vmem:[#allocation8 + $0x50] ss:$8 sps:$4 sm:$0xff]  }
  0x7e   :  { %346 = vmatprep.subr.bf16.mxu0 %v1853_v9  ;;  %389 = vmatprep.subr.bf16.mxu1 %v1877_v24  ;;  %v1909_v48 = vld [vmem:[#allocation8 + $0x64] ss:$8 sps:$4 sm:$0xff]   ;;  %v1907_v49 = vld [vmem:[#allocation8 + $0x60] ss:$8 sps:$4 sm:$0xff]   ;;  %v1912_v50 = vld [vmem:[#allocation8 + $0x74] ss:$8 sps:$4 sm:$0xff]  }
  0x7f   :  { %v1910_v51 = vld [vmem:[#allocation8 + $0x70] ss:$8 sps:$4 sm:$0xff]   ;;  %v1915_v52 = vld [vmem:[#allocation8 + $0x84] ss:$8 sps:$4 sm:$0xff]   ;;  %v1913_v53 = vld [vmem:[#allocation8 + $0x80] ss:$8 sps:$4 sm:$0xff]  }
  0x80   :  { %v1918_v54 = vld [vmem:[#allocation8 + $0x94] ss:$8 sps:$4 sm:$0xff]   ;;  %v1916_v55 = vld [vmem:[#allocation8 + $0x90] ss:$8 sps:$4 sm:$0xff]   ;;  %v1921_v56 = vld [vmem:[#allocation8 + $0xa4] ss:$8 sps:$4 sm:$0xff]  }
  0x81   :  { %347 = vmatpush1.bf16.msra.mxu0 %v1855_v13  ;;  %390 = vmatpush1.bf16.msra.mxu1 %v1879_v28  ;;  %v1919_v57 = vld [vmem:[#allocation8 + $0xa0] ss:$8 sps:$4 sm:$0xff]   ;;  %v1924_v58 = vld [vmem:[#allocation8 + $0xb4] ss:$8 sps:$4 sm:$0xff]   ;;  %v1922_v59 = vld [vmem:[#allocation8 + $0xb0] ss:$8 sps:$4 sm:$0xff]  }
  0x82   :  { %348 = vmatprep.subr.bf16.mxu0 %v1856_v15  ;;  %391 = vmatprep.subr.bf16.mxu1 %v1880_v29  ;;  %v1927_v60 = vld [vmem:[#allocation8 + $0xc4] ss:$8 sps:$4 sm:$0xff]   ;;  %v1925_v61 = vld [vmem:[#allocation8 + $0xc0] ss:$8 sps:$4 sm:$0xff]   ;;  %v1930_v62 = vld [vmem:[#allocation8 + $0xd4] ss:$8 sps:$4 sm:$0xff]  }
  0x83   :  { %v1928_v63 = vld [vmem:[#allocation8 + $0xd0] ss:$8 sps:$4 sm:$0xff]   ;;  %v1933_v1 = vld [vmem:[#allocation8 + $0xe4] ss:$8 sps:$4 sm:$0xff]   ;;  %v1931_v2 = vld [vmem:[#allocation8 + $0xe0] ss:$8 sps:$4 sm:$0xff]  }
  0x84   :  { %v1936_v3 = vld [vmem:[#allocation8 + $0xf4] ss:$8 sps:$4 sm:$0xff]   ;;  %v1934_v4 = vld [vmem:[#allocation8 + $0xf0] ss:$8 sps:$4 sm:$0xff]   ;;  %v1939_v5 = vld [vmem:[#allocation8 + $0x104] ss:$8 sps:$4 sm:$0xff]  }
  0x85   :  { %349 = vmatpush1.bf16.msra.mxu0 %v1858_v17  ;;  %392 = vmatpush1.bf16.msra.mxu1 %v1882_v32  ;;  %v1987_v7 = vld [vmem:[#allocation10 + $0x4] ss:$16 sps:$4 sm:$0xff]   ;;  %v1988_v9 = vld [vmem:[#allocation10 + $0x20] ss:$16 sps:$4 sm:$0xff]   ;;  %v2412_v12 = vsub.s32 0, %v2409_v11  ;;  %v2418_v14 = vsub.s32 1, %v2409_v11 }
  0x86   :  { %350 = vmatprep.subr.bf16.mxu0 %v1859_v19  ;;  %393 = vmatprep.subr.bf16.mxu1 %v1883_v34  ;;  %v1990_v8 = vld [vmem:[#allocation10 + $0x24] ss:$16 sps:$4 sm:$0xff]   ;;  %v156_v13 = vld [vmem:[%s2461_s3] sm:$0xf]  ;;  %v168_v27 = vsub.s32 2, %v2409_v11  ;;  %s2246_s30 = smov [#allocation13]  }
  0x87   :  { %v161_v15 = vrot.slane %v156_v13, %v2412_v12  ;;  %v165_v16 = vrot.slane %v156_v13, %v2418_v14  ;;  %v1942_v34 = vld [vmem:[#allocation8 + $0x114] ss:$8 sps:$4 sm:$0xff]   ;;  %v1973_v10 = vld [vmem:[#allocation8 + $0x1c0] ss:$8 sps:$4 sm:$0xff]   ;;  %s1597_s11 = sshll.u32 %s2246_s30, 4  ;;  %s1598_s11 = int_to_ptr.vmem [resolvable:$true] %s1597_s11 }
  0x88   :  { %s2201_s4 = scalar_lea.vmem %s1598_s11, 768  ;;  %p2206_p7 = scmp.lt.s32.totalorder %s1598_s11, %s1598_s11 }
  0x89   :  { %351 = vmatpush1.bf16.msra.mxu0 %v1861_v21  ;;  %394 = vmatpush1.bf16.msra.mxu1 %v1885_v36  ;;  %p2202_p6 = scmp.ne.s32.totalorder %s1598_s11, %s2201_s4  ;;  %p2207_p8 = scmp.lt.s32.totalorder %s2201_s4, %s2201_s4 }
  0x8a   :  { %352 = vmatprep.subr.bf16.mxu0 %v1862_v23  ;;  %395 = vmatprep.subr.bf16.mxu1 %v1886_v38 }
  0x8b   :  { %p2208_p9 = por %p2207_p8, %p2206_p7 }
  0x8d   :  { %353 = vmatpush1.bf16.msra.mxu0 %v1864_v25  ;;  %396 = vmatpush1.bf16.msra.mxu1 %v1888_v40  ;;  %p2209_p10 = pnand %p2208_p9, %p2202_p6 }
  0x8e   :  { %832 = vmatprep.subr.bf16.mxu0 %v1891_v30  ;;  %1143 = vmatprep.subr.bf16.mxu1 %v1987_v7  ;;  %v172_v30 = vsub.s32 3, %v2409_v11  ;;  %v1972_v7 = vld [vmem:[#allocation8 + $0x1b4] ss:$8 sps:$4 sm:$0xff]  }
  0x90   :  { %371 = vmatmul.mubr.bf16.vlgmr.msra.gmra.mrb[0].mxu0 %v121_v31  ;;  %414 = vmatmul.mubr.bf16.vlgmr.msra.gmra.mrb[0].mxu1 %v121_v31  ;;  %v173_v36 = vrot.slane %v156_v13, %v172_v30 }
  0x91   :  { %833 = vmatpush1.bf16.msra.mxu0 %v1889_v33  ;;  %1175 = vmatprep.mubr.bf16.mxu1 %v2245_v0  ;;  %v1937_v33 = vld [vmem:[#allocation8 + $0x100] ss:$8 sps:$4 sm:$0xff]  }
  0x92   :  { %834 = vmatprep.subr.bf16.mxu0 %v1894_v35  ;;  %1144 = vmatpush1.bf16.msra.mxu1 %v1985_v6  ;;  %v169_v35 = vrot.slane %v156_v13, %v168_v27  ;;  %v1967_v6 = vld [vmem:[#allocation8 + $0x1a0] ss:$8 sps:$4 sm:$0xff]   ;;  %v1978_v13 = vld [vmem:[#allocation8 + $0x1d4] ss:$8 sps:$4 sm:$0xff]  }
  0x93   :  { %1145 = vmatprep.subr.bf16.mxu1 %v1990_v8  ;;  %v1970_v8 = vld [vmem:[#allocation8 + $0x1b0] ss:$8 sps:$4 sm:$0xff]  }
  0x95   :  { %835 = vmatpush1.bf16.msra.mxu0 %v1892_v37  ;;  %v1940_v37 = vld [vmem:[#allocation8 + $0x110] ss:$8 sps:$4 sm:$0xff]  }
  0x96   :  { %836 = vmatprep.subr.bf16.mxu0 %v1897_v39  ;;  %1146 = vmatpush1.bf16.msra.mxu1 %v1988_v9  ;;  %v1945_v39 = vld [vmem:[#allocation8 + $0x124] ss:$8 sps:$4 sm:$0xff]  }
  0x97   :  { %v1975_v9 = vld [vmem:[#allocation8 + $0x1c4] ss:$8 sps:$4 sm:$0xff]  }
  0x99   :  { %837 = vmatpush1.bf16.msra.mxu0 %v1895_v41 }
  0x9a   :  { %838 = vmatprep.subr.bf16.mxu0 %v1900_v42 }
  0x9d   :  { %839 = vmatpush1.bf16.msra.mxu0 %v1898_v43 }
  0x9e   :  { %840 = vmatprep.subr.bf16.mxu0 %v1903_v44 }
  0xa1   :  { %841 = vmatpush1.bf16.msra.mxu0 %v1901_v45 }
  0xa2   :  { %842 = vmatprep.subr.bf16.mxu0 %v1906_v46 }
  0xa5   :  { %843 = vmatpush1.bf16.msra.mxu0 %v1904_v47  ;;  %v1943_v47 = vld [vmem:[#allocation8 + $0x120] ss:$8 sps:$4 sm:$0xff]  }
  0xa6   :  { %844 = vmatprep.subr.bf16.mxu0 %v1909_v48 }
  0xa9   :  { %845 = vmatpush1.bf16.msra.mxu0 %v1907_v49 }
  0xaa   :  { %846 = vmatprep.subr.bf16.mxu0 %v1912_v50  ;;  %v1948_v50 = vld [vmem:[#allocation8 + $0x134] ss:$8 sps:$4 sm:$0xff]  }
  0xad   :  { %847 = vmatpush1.bf16.msra.mxu0 %v1910_v51 }
  0xae   :  { %848 = vmatprep.subr.bf16.mxu0 %v1915_v52 }
  0xb1   :  { %849 = vmatpush1.bf16.msra.mxu0 %v1913_v53 }
  0xb2   :  { %850 = vmatprep.subr.bf16.mxu0 %v1918_v54  ;;  %v1946_v54 = vld [vmem:[#allocation8 + $0x130] ss:$8 sps:$4 sm:$0xff]  }
  0xb5   :  { %851 = vmatpush1.bf16.msra.mxu0 %v1916_v55 }
  0xb6   :  { %852 = vmatprep.subr.bf16.mxu0 %v1921_v56  ;;  %v1951_v56 = vld [vmem:[#allocation8 + $0x144] ss:$8 sps:$4 sm:$0xff]  }
  0xb9   :  { %853 = vmatpush1.bf16.msra.mxu0 %v1919_v57  ;;  %v1949_v57 = vld [vmem:[#allocation8 + $0x140] ss:$8 sps:$4 sm:$0xff]  }
  0xba   :  { %854 = vmatprep.subr.bf16.mxu0 %v1924_v58  ;;  %v1954_v58 = vld [vmem:[#allocation8 + $0x154] ss:$8 sps:$4 sm:$0xff]  }
  0xbd   :  { %855 = vmatpush1.bf16.msra.mxu0 %v1922_v59  ;;  %v1952_v59 = vld [vmem:[#allocation8 + $0x150] ss:$8 sps:$4 sm:$0xff]  }
  0xbe   :  { %856 = vmatprep.subr.bf16.mxu0 %v1927_v60  ;;  %v1957_v60 = vld [vmem:[#allocation8 + $0x164] ss:$8 sps:$4 sm:$0xff]  }
  0xc1   :  { %857 = vmatpush1.bf16.msra.mxu0 %v1925_v61  ;;  %v1955_v61 = vld [vmem:[#allocation8 + $0x160] ss:$8 sps:$4 sm:$0xff]  }
  0xc2   :  { %858 = vmatprep.subr.bf16.mxu0 %v1930_v62  ;;  %v1960_v62 = vld [vmem:[#allocation8 + $0x174] ss:$8 sps:$4 sm:$0xff]  }
  0xc5   :  { %859 = vmatpush1.bf16.msra.mxu0 %v1928_v63  ;;  %v1958_v63 = vld [vmem:[#allocation8 + $0x170] ss:$8 sps:$4 sm:$0xff]  }
  0xc6   :  { %860 = vmatprep.subr.bf16.mxu0 %v1933_v1  ;;  %v1963_v1 = vld [vmem:[#allocation8 + $0x184] ss:$8 sps:$4 sm:$0xff]  }
  0xc9   :  { %861 = vmatpush1.bf16.msra.mxu0 %v1931_v2  ;;  %v1961_v2 = vld [vmem:[#allocation8 + $0x180] ss:$8 sps:$4 sm:$0xff]  }
  0xca   :  { %862 = vmatprep.subr.bf16.mxu0 %v1936_v3  ;;  %v1966_v3 = vld [vmem:[#allocation8 + $0x194] ss:$8 sps:$4 sm:$0xff]  }
  0xcd   :  { %863 = vmatpush1.bf16.msra.mxu0 %v1934_v4  ;;  %v1964_v4 = vld [vmem:[#allocation8 + $0x190] ss:$8 sps:$4 sm:$0xff]  }
  0xce   :  { %875 = vmatprep.subr.bf16.mxu0 %v1939_v5  ;;  %v1969_v5 = vld [vmem:[#allocation8 + $0x1a4] ss:$8 sps:$4 sm:$0xff]  }
 0x163   :  { %v372_v17 = vpop.f32.mrb[0].mxu0  ;;  %v415_v38 = vpop.f32.mrb[0].mxu1 }
 0x164   :  { %v373_v18 = vadd.f32 %v372_v17, %v161_v15  ;;  %v374_v19 = vpop.f32.mrb[1].mxu0  ;;  %v416_v40 = vadd.f32 %v415_v38, %v169_v35  ;;  %v417_v41 = vpop.f32.mrb[1].mxu1  ;;  %v1979_v17 = vld [vmem:[#allocation8 + $0x1e0] ss:$8 sps:$4 sm:$0xff]  }
 0x165   :  { %v375_v20 = vadd.f32 %v374_v19, %v165_v16  ;;  %v376_v21 = vpop.f32.mrb[2].mxu0  ;;  %v418_v42 = vadd.f32 %v417_v41, %v173_v36  ;;  %v419_v43 = vpop.f32.mrb[2].mxu1  ;;  %v1982_v19 = vld [vmem:[#allocation8 + $0x1f0] ss:$8 sps:$4 sm:$0xff]  }
 0x166   :  { %v377_v22 = vadd.f32 %v376_v21, %v161_v15  ;;  %v378_v23 = vpop.f32.mrb[3].mxu0  ;;  %v424_v25 = vmax.f32 %v373_v18, 0.0  ;;  %v426_v44 = vmax.f32 %v416_v40, 0.0  ;;  %v420_v45 = vadd.f32 %v419_v43, %v169_v35  ;;  %v421_v46 = vpop.f32.mrb[3].mxu1  ;;  %v1976_v15 = vld [vmem:[#allocation8 + $0x1d0] ss:$8 sps:$4 sm:$0xff]  }
 0x167   :  { %v379_v24 = vadd.f32 %v378_v23, %v165_v16  ;;  %v425_v28 = vmax.f32 %v375_v20, 0.0  ;;  %v427_v48 = vmax.f32 %v418_v42, 0.0  ;;  %v422_v49 = vadd.f32 %v421_v46, %v173_v36  ;;  %v1981_v16 = vld [vmem:[#allocation8 + $0x1e4] ss:$8 sps:$4 sm:$0xff]   ;;  %v1984_v18 = vld [vmem:[#allocation8 + $0x1f4] ss:$8 sps:$4 sm:$0xff]  }
 0x168   :  { %v428_v26 = vmax.f32 %v377_v22, 0.0  ;;  %v430_v51 = vmax.f32 %v420_v45, 0.0  ;;  %v1993_v20 = vld [vmem:[#allocation10 + $0x44] ss:$16 sps:$4 sm:$0xff]   ;;  %v1991_v21 = vld [vmem:[#allocation10 + $0x40] ss:$16 sps:$4 sm:$0xff]  }
 0x169   :  { %v429_v29 = vmax.f32 %v379_v24, 0.0  ;;  %v431_v52 = vmax.f32 %v422_v49, 0.0  ;;  %1147 = vmatprep.subr.bf16.mxu1 %v1993_v20  ;;  %v1996_v22 = vld [vmem:[#allocation10 + $0x64] ss:$16 sps:$4 sm:$0xff]   ;;  %v1994_v23 = vld [vmem:[#allocation10 + $0x60] ss:$16 sps:$4 sm:$0xff]  }
 0x16a   :  { %v432_v31 = vpack.c.bf16 %v428_v26, %v424_v25  ;;  %v434_v53 = vpack.c.bf16 %v430_v51, %v426_v44  ;;  %1148 = vmatpush1.bf16.msra.mxu1 %v1991_v21  ;;  %v1999_v24 = vld [vmem:[#allocation10 + $0x84] ss:$16 sps:$4 sm:$0xff]   ;;  %v1997_v25 = vld [vmem:[#allocation10 + $0x80] ss:$16 sps:$4 sm:$0xff]   ;;  %v2040_v20 = vld [vmem:[#allocation11 + $0x18] sm:$0xff]  }
 0x16b   :  { %v433_v32 = vpack.c.bf16 %v429_v29, %v425_v28  ;;  %v435_v55 = vpack.c.bf16 %v431_v52, %v427_v48  ;;  %1149 = vmatprep.subr.bf16.mxu1 %v1996_v22  ;;  %v2002_v26 = vld [vmem:[#allocation10 + $0xa4] ss:$16 sps:$4 sm:$0xff]   ;;  %v2000_v28 = vld [vmem:[#allocation10 + $0xa0] ss:$16 sps:$4 sm:$0xff]   ;;  %v123_v52 = vld [vmem:[#allocation5 + $0x8] sm:$0xff] }
 0x16c   :  { %v2005_v29 = vld [vmem:[#allocation10 + $0xc4] ss:$16 sps:$4 sm:$0xff]   ;;  %v500_v35 = vld [vmem:[%s2463_s5] sm:$0x3] }
 0x16d   :  { %864 = vmatprep.mubr.bf16.mxu0 %v433_v32  ;;  %v2008_v32 = vld [vmem:[#allocation10 + $0xe4] ss:$16 sps:$4 sm:$0xff]   ;;  %v505_v36 = vrot.slane %v500_v35, %v2412_v12 }
 0x16e   :  { %865 = vmatmul.mubr.bf16.vlgmr.msra.gmra.mrb[4].mxu0 %v432_v31  ;;  %1150 = vmatpush1.bf16.msra.mxu1 %v1994_v23  ;;  %v2003_v31 = vld [vmem:[#allocation10 + $0xc0] ss:$16 sps:$4 sm:$0xff]   ;;  %v2043_v23 = vld [vmem:[#allocation11 + $0x68] sm:$0xff]  }
 0x16f   :  { %876 = vmatpush1.bf16.msra.mxu0 %v1937_v33  ;;  %907 = vmatprep.mubr.bf16.mxu0 %v435_v55  ;;  %v2006_v33 = vld [vmem:[#allocation10 + $0xe0] ss:$16 sps:$4 sm:$0xff]  }
 0x170   :  { %877 = vmatprep.subr.bf16.mxu0 %v1942_v34  ;;  %1151 = vmatprep.subr.bf16.mxu1 %v1999_v24  ;;  %v2011_v34 = vld [vmem:[#allocation10 + $0xc] ss:$16 sps:$4 sm:$0xff]   ;;  %v2041_v21 = vld [vmem:[#allocation11 + $0x60] sm:$0xff]  }
 0x171   :  { %v2042_v22 = vld [vmem:[#allocation11 + $0x20] sm:$0xff]   ;;  %v2044_v24 = vld [vmem:[#allocation11 + $0x28] sm:$0xff]  }
 0x172   :  { %1152 = vmatpush1.bf16.msra.mxu1 %v1997_v25  ;;  %v2045_v25 = vld [vmem:[#allocation11 + $0x70] sm:$0xff]  }
 0x173   :  { %878 = vmatpush1.bf16.msra.mxu0 %v1940_v37  ;;  %1153 = vmatprep.subr.bf16.mxu1 %v2002_v26  ;;  %v509_v37 = vrot.slane %v500_v35, %v2418_v14  ;;  %v2046_v26 = vld [vmem:[#allocation11 + $0x30] sm:$0xff]  }
 0x174   :  { %879 = vmatprep.subr.bf16.mxu0 %v1945_v39 }
 0x176   :  { %1154 = vmatpush1.bf16.msra.mxu1 %v2000_v28  ;;  %v2047_v28 = vld [vmem:[#allocation11 + $0x78] sm:$0xff]  }
 0x177   :  { %880 = vmatpush1.bf16.msra.mxu0 %v1943_v47  ;;  %1155 = vmatprep.subr.bf16.mxu1 %v2005_v29  ;;  %v2048_v29 = vld [vmem:[#allocation11 + $0x38] sm:$0xff]  }
 0x178   :  { %881 = vmatprep.subr.bf16.mxu0 %v1948_v50  ;;  %v122_v50 = vld [vmem:[#allocation5] sm:$0xff] }
 0x17a   :  { %1156 = vmatpush1.bf16.msra.mxu1 %v2003_v31  ;;  %v2049_v31 = vld [vmem:[#allocation11 + $0xc0] sm:$0xff]  }
 0x17b   :  { %882 = vmatpush1.bf16.msra.mxu0 %v1946_v54  ;;  %1157 = vmatprep.subr.bf16.mxu1 %v2008_v32  ;;  %v961_v32 = vld [vmem:[%s2465_s7] sm:$0xf] }
 0x17c   :  { %883 = vmatprep.subr.bf16.mxu0 %v1951_v56 }
 0x17e   :  { %1158 = vmatpush1.bf16.msra.mxu1 %v2006_v33  ;;  %v966_v33 = vrot.slane %v961_v32, %v2412_v12  ;;  %v2052_v12 = vld [vmem:[#allocation11 + $0x88] sm:$0xff]  }
 0x17f   :  { %884 = vmatpush1.bf16.msra.mxu0 %v1949_v57  ;;  %1186 = vmatprep.subr.bf16.mxu1 %v2011_v34  ;;  %v970_v34 = vrot.slane %v961_v32, %v2418_v14  ;;  %v2053_v14 = vld [vmem:[#allocation11 + $0xd0] sm:$0xff]  }
 0x180   :  { %885 = vmatprep.subr.bf16.mxu0 %v1954_v58  ;;  %v2009_v58 = vld [vmem:[#allocation10 + $0x8] ss:$16 sps:$4 sm:$0xff]  }
 0x183   :  { %886 = vmatpush1.bf16.msra.mxu0 %v1952_v59 }
 0x184   :  { %887 = vmatprep.subr.bf16.mxu0 %v1957_v60  ;;  %v2014_v60 = vld [vmem:[#allocation10 + $0x2c] ss:$16 sps:$4 sm:$0xff]  }
 0x187   :  { %888 = vmatpush1.bf16.msra.mxu0 %v1955_v61  ;;  %v2012_v61 = vld [vmem:[#allocation10 + $0x28] ss:$16 sps:$4 sm:$0xff]  }
 0x188   :  { %889 = vmatprep.subr.bf16.mxu0 %v1960_v62  ;;  %v2017_v62 = vld [vmem:[#allocation10 + $0x4c] ss:$16 sps:$4 sm:$0xff]  }
 0x18b   :  { %890 = vmatpush1.bf16.msra.mxu0 %v1958_v63  ;;  %v2015_v63 = vld [vmem:[#allocation10 + $0x48] ss:$16 sps:$4 sm:$0xff]  }
 0x18c   :  { %891 = vmatprep.subr.bf16.mxu0 %v1963_v1  ;;  %v2020_v1 = vld [vmem:[#allocation10 + $0x6c] ss:$16 sps:$4 sm:$0xff]  }
 0x18f   :  { %892 = vmatpush1.bf16.msra.mxu0 %v1961_v2  ;;  %v2018_v2 = vld [vmem:[#allocation10 + $0x68] ss:$16 sps:$4 sm:$0xff]  }
 0x190   :  { %893 = vmatprep.subr.bf16.mxu0 %v1966_v3  ;;  %v2023_v3 = vld [vmem:[#allocation10 + $0x8c] ss:$16 sps:$4 sm:$0xff]  }
 0x193   :  { %894 = vmatpush1.bf16.msra.mxu0 %v1964_v4  ;;  %v2021_v4 = vld [vmem:[#allocation10 + $0x88] ss:$16 sps:$4 sm:$0xff]  }
 0x194   :  { %895 = vmatprep.subr.bf16.mxu0 %v1969_v5  ;;  %v2026_v5 = vld [vmem:[#allocation10 + $0xac] ss:$16 sps:$4 sm:$0xff]  }
 0x197   :  { %896 = vmatpush1.bf16.msra.mxu0 %v1967_v6  ;;  %v2024_v6 = vld [vmem:[#allocation10 + $0xa8] ss:$16 sps:$4 sm:$0xff]  }
 0x198   :  { %897 = vmatprep.subr.bf16.mxu0 %v1972_v7  ;;  %v2029_v7 = vld [vmem:[#allocation10 + $0xcc] ss:$16 sps:$4 sm:$0xff]  }
 0x19b   :  { %898 = vmatpush1.bf16.msra.mxu0 %v1970_v8  ;;  %v2032_v8 = vld [vmem:[#allocation10 + $0xec] ss:$16 sps:$4 sm:$0xff]  }
 0x19c   :  { %899 = vmatprep.subr.bf16.mxu0 %v1975_v9  ;;  %v2030_v9 = vld [vmem:[#allocation10 + $0xe8] ss:$16 sps:$4 sm:$0xff]  }
 0x19f   :  { %900 = vmatpush1.bf16.msra.mxu0 %v1973_v10  ;;  %v2033_v10 = vld [vmem:[#allocation11 + $0x40] sm:$0xff]  }
 0x1a0   :  { %901 = vmatprep.subr.bf16.mxu0 %v1978_v13  ;;  %v2034_v13 = vld [vmem:[#allocation11] sm:$0xff]  }
 0x1a3   :  { %902 = vmatpush1.bf16.msra.mxu0 %v1976_v15  ;;  %v2035_v15 = vld [vmem:[#allocation11 + $0x48] sm:$0xff]  }
 0x1a4   :  { %903 = vmatprep.subr.bf16.mxu0 %v1981_v16  ;;  %v2036_v16 = vld [vmem:[#allocation11 + $0x8] sm:$0xff]  }
 0x1a7   :  { %904 = vmatpush1.bf16.msra.mxu0 %v1979_v17  ;;  %v2037_v17 = vld [vmem:[#allocation11 + $0x50] sm:$0xff]  }
 0x1a8   :  { %905 = vmatprep.subr.bf16.mxu0 %v1984_v18  ;;  %v2038_v18 = vld [vmem:[#allocation11 + $0x10] sm:$0xff]  }
 0x1ab   :  { %906 = vmatpush1.bf16.msra.mxu0 %v1982_v19  ;;  %v2039_v19 = vld [vmem:[#allocation11 + $0x58] sm:$0xff]  }
 0x1ae   :  { %908 = vmatmul.mubr.bf16.vlgmr.msra.gmra.mrb[4].mxu0 %v434_v53 }
 0x281   :  { %v909_v38 = vpop.f32.mrb[4].mxu0 }
 0x282   :  { %v1817_v39 = vadd.f32 %v909_v38, %v505_v36  ;;  %v911_v40 = vpop.f32.mrb[5].mxu0 }
 0x283   :  { %v1818_v41 = vadd.f32 %v911_v40, %v509_v37  ;;  %v913_v42 = vpop.f32.mrb[6].mxu0 }
 0x284   :  { %1588 = vst [vmem:[#allocation13 + $0x8] sm:$0xff] %v1817_v39  ;;  %v1819_v43 = vadd.f32 %v913_v42, %v505_v36  ;;  %v915_v44 = vpop.f32.mrb[7].mxu0 }
 0x285   :  { %v918_v45 = vmul.f32 0.5, %v1818_v41  ;;  %1590 = vst [vmem:[#allocation13 + $0x10] sm:$0xff] %v1818_v41  ;;  %v1820_v46 = vadd.f32 %v915_v44, %v509_v37 }
 0x286   :  { %1589 = vst [vmem:[#allocation13 + $0x20] sm:$0xff] %v1819_v43 }
 0x287   :  { %v920_v47 = vmul.f32 1.442695, %v918_v45  ;;  %v919_v48 = vmul.f32 0.5, %v1820_v46  ;;  %1591 = vst [vmem:[#allocation13 + $0x28] sm:$0xff] %v1820_v46 }
 0x289   :  { %2065 = vpow2.f32 %v920_v47  ;;  %v922_v49 = vmul.f32 1.442695, %v919_v48 }
 0x28b   :  { %2067 = vpow2.f32 %v922_v49  ;;  %v2050_v49 = vld [vmem:[#allocation11 + $0x80] sm:$0xff]  }
 0x293   :  { %v2066_v51 = vpop.eup %2065 }
 0x294   :  { %v924_v53 = vmul.f32 %v2066_v51, %v122_v50  ;;  %v2051_v50 = vld [vmem:[#allocation11 + $0xc8] sm:$0xff]   ;;  %v2054_v51 = vld [vmem:[#allocation11 + $0x90] sm:$0xff]  }
 0x295   :  { %v2068_v54 = vpop.eup %2067 }
 0x296   :  { %v925_v55 = vmul.f32 %v2068_v54, %v123_v52  ;;  %v926_v56 = vadd.f32 %v1817_v39, %v924_v53  ;;  %v2055_v52 = vld [vmem:[#allocation11 + $0xd8] sm:$0xff]   ;;  %v2057_v54 = vld [vmem:[#allocation11 + $0xe0] sm:$0xff]  }
 0x297   :  { %v2056_v53 = vld [vmem:[#allocation11 + $0x98] sm:$0xff]  }
 0x298   :  { %v927_v57 = vadd.f32 %v1819_v43, %v925_v55  ;;  %v2058_v55 = vld [vmem:[#allocation11 + $0xa0] sm:$0xff]  }
 0x29a   :  { %v928_v59 = vpack.c.bf16 %v927_v57, %v926_v56  ;;  %v2059_v56 = vld [vmem:[#allocation11 + $0xe8] sm:$0xff]  }
 0x29b   :  { %v2060_v57 = vld [vmem:[#allocation11 + $0xa8] sm:$0xff]  }
 0x29c   :  { %1176 = vmatmul.mubr.bf16.vlgmr.msra.gmra.mrb[4].mxu1 %v928_v59 }
 0x29d   :  { %1187 = vmatpush1.bf16.msra.mxu1 %v2009_v58  ;;  %1218 = vmatprep.mubr.bf16.mxu1 %v2245_v0  ;;  %v2027_v0 = vld [vmem:[#allocation10 + $0xc8] ss:$16 sps:$4 sm:$0xff]   ;;  %v974_v58 = vrot.slane %v961_v32, %v168_v27 }
 0x29e   :  { %1188 = vmatprep.subr.bf16.mxu1 %v2014_v60  ;;  %v978_v60 = vrot.slane %v961_v32, %v172_v30 }
 0x2a1   :  { %1189 = vmatpush1.bf16.msra.mxu1 %v2012_v61 }
 0x2a2   :  { %1190 = vmatprep.subr.bf16.mxu1 %v2017_v62  ;;  %v2062_v62 = vld [vmem:[#allocation11 + $0xb0] sm:$0xff]  }
 0x2a5   :  { %1191 = vmatpush1.bf16.msra.mxu1 %v2015_v63 }
 0x2a6   :  { %1192 = vmatprep.subr.bf16.mxu1 %v2020_v1 }
 0x2a9   :  { %1193 = vmatpush1.bf16.msra.mxu1 %v2018_v2  ;;  %v2063_v2 = vld [vmem:[#allocation11 + $0xf8] sm:$0xff]  }
 0x2aa   :  { %1194 = vmatprep.subr.bf16.mxu1 %v2023_v3 }
 0x2ad   :  { %1195 = vmatpush1.bf16.msra.mxu1 %v2021_v4 }
 0x2ae   :  { %1196 = vmatprep.subr.bf16.mxu1 %v2026_v5 }
 0x2b1   :  { %1197 = vmatpush1.bf16.msra.mxu1 %v2024_v6 }
 0x2b2   :  { %1198 = vmatprep.subr.bf16.mxu1 %v2029_v7 }
 0x2b5   :  { %1199 = vmatpush1.bf16.msra.mxu1 %v2027_v0  ;;  %v2064_v0 = vld [vmem:[#allocation11 + $0xb8] sm:$0xff]  }
 0x2b6   :  { %1200 = vmatprep.subr.bf16.mxu1 %v2032_v8 }
 0x2b9   :  { %1201 = vmatpush1.bf16.msra.mxu1 %v2030_v9 }
 0x2ba   :  { %1773 = vmatprep.subr.bf16.mxu1 %v2033_v10 }
 0x2bc   :  { %1219 = vmatmul.mubr.bf16.vlgmr.msra.gmra.mrb[8].mxu1 %v928_v59  ;;  %v2061_v59 = vld [vmem:[#allocation11 + $0xf0] sm:$0xff]  }
 0x2bd   :  { %1774 = vmatpush3.bf16.msra.mxu1 %v2034_v13 }
 0x2be   :  { %1775 = vmatprep.subr.bf16.mxu1 %v2035_v15 }
 0x2c1   :  { %1776 = vmatpush3.bf16.msra.mxu1 %v2036_v16 }
 0x2c2   :  { %1777 = vmatprep.subr.bf16.mxu1 %v2037_v17 }
 0x2c5   :  { %1778 = vmatpush3.bf16.msra.mxu1 %v2038_v18 }
 0x2c6   :  { %1779 = vmatprep.subr.bf16.mxu1 %v2039_v19 }
 0x2c9   :  { %1780 = vmatpush3.bf16.msra.mxu1 %v2040_v20  ;;  %v1740_v20 = vld [vmem:[%s2467_s9] ss:$0 sm:$0xff] }
 0x2ca   :  { %1781 = vmatprep.subr.bf16.mxu1 %v2041_v21 }
 0x2cd   :  { %1782 = vmatpush3.bf16.msra.mxu1 %v2042_v22 }
 0x2ce   :  { %1783 = vmatprep.subr.bf16.mxu1 %v2043_v23 }
 0x2d1   :  { %1784 = vmatpush3.bf16.msra.mxu1 %v2044_v24 }
 0x2d2   :  { %1785 = vmatprep.subr.bf16.mxu1 %v2045_v25 }
 0x2d5   :  { %1786 = vmatpush3.bf16.msra.mxu1 %v2046_v26 }
 0x2d6   :  { %1787 = vmatprep.subr.bf16.mxu1 %v2047_v28 }
 0x2d9   :  { %1788 = vmatpush3.bf16.msra.mxu1 %v2048_v29 }
 0x2da   :  { %1795 = vmatprep.subr.bf16.mxu1 %v2049_v31 }
 0x36f   :  { %v1177_v35 = vpop.f32.mrb[4].mxu1 }
 0x370   :  { %v1178_v36 = vadd.f32 %v1177_v35, %v966_v33  ;;  %v1179_v37 = vpop.f32.mrb[5].mxu1 }
 0x371   :  { %v1180_v38 = vadd.f32 %v1179_v37, %v970_v34  ;;  %v1181_v39 = vpop.f32.mrb[6].mxu1 }
 0x372   :  { %v1182_v40 = vadd.f32 %v1181_v39, %v966_v33  ;;  %v1183_v41 = vpop.f32.mrb[7].mxu1  ;;  %v1229_v43 = vmax.f32 %v1178_v36, 0.0 }
 0x373   :  { %v1184_v42 = vadd.f32 %v1183_v41, %v970_v34  ;;  %v1230_v45 = vmax.f32 %v1180_v38, 0.0 }
 0x374   :  { %v1233_v44 = vmax.f32 %v1182_v40, 0.0 }
 0x375   :  { %v1234_v46 = vmax.f32 %v1184_v42, 0.0 }
 0x376   :  { %v1237_v47 = vpack.c.bf16 %v1233_v44, %v1229_v43 }
 0x377   :  { %v1238_v48 = vpack.c.bf16 %v1234_v46, %v1230_v45 }
 0x379   :  { %1536 = vmatprep.mubr.bf16.mxu1 %v1238_v48 }
 0x37a   :  { %1537 = vmatmul.mubr.bf16.vlgmr.msra.gmra.mrb[12].mxu1 %v1237_v47 }
 0x37b   :  { %1796 = vmatpush3.bf16.msra.mxu1 %v2050_v49 }
 0x37c   :  { %1797 = vmatprep.subr.bf16.mxu1 %v2051_v50 }
 0x37f   :  { %1798 = vmatpush3.bf16.msra.mxu1 %v2052_v12 }
 0x380   :  { %1799 = vmatprep.subr.bf16.mxu1 %v2053_v14 }
 0x383   :  { %1800 = vmatpush3.bf16.msra.mxu1 %v2054_v51 }
 0x384   :  { %1801 = vmatprep.subr.bf16.mxu1 %v2055_v52 }
 0x387   :  { %1802 = vmatpush3.bf16.msra.mxu1 %v2056_v53 }
 0x388   :  { %1803 = vmatprep.subr.bf16.mxu1 %v2057_v54 }
 0x38b   :  { %1804 = vmatpush3.bf16.msra.mxu1 %v2058_v55 }
 0x38c   :  { %1805 = vmatprep.subr.bf16.mxu1 %v2059_v56 }
 0x38f   :  { %v1220_v61 = vpop.f32.mrb[8].mxu1  ;;  %1806 = vmatpush3.bf16.msra.mxu1 %v2060_v57 }
 0x390   :  { %v1221_v63 = vadd.f32 %v1220_v61, %v974_v58  ;;  %v1222_v1 = vpop.f32.mrb[9].mxu1  ;;  %1807 = vmatprep.subr.bf16.mxu1 %v2061_v59 }
 0x391   :  { %v1223_v3 = vadd.f32 %v1222_v1, %v978_v60  ;;  %v1224_v4 = vpop.f32.mrb[10].mxu1 }
 0x392   :  { %v1225_v5 = vadd.f32 %v1224_v4, %v974_v58  ;;  %v1226_v6 = vpop.f32.mrb[11].mxu1  ;;  %v1231_v8 = vmax.f32 %v1221_v63, 0.0 }
 0x393   :  { %v1227_v7 = vadd.f32 %v1226_v6, %v978_v60  ;;  %1808 = vmatpush3.bf16.msra.mxu1 %v2062_v62  ;;  %v1232_v9 = vmax.f32 %v1223_v3, 0.0 }
 0x394   :  { %v1235_v27 = vmax.f32 %v1225_v5, 0.0  ;;  %1809 = vmatprep.subr.bf16.mxu1 %v2063_v2 }
 0x395   :  { %v1236_v11 = vmax.f32 %v1227_v7, 0.0 }
 0x396   :  { %v1239_v30 = vpack.c.bf16 %v1235_v27, %v1231_v8 }
 0x397   :  { %v1240_v10 = vpack.c.bf16 %v1236_v11, %v1232_v9  ;;  %1810 = vmatpush3.bf16.msra.mxu1 %v2064_v0 }
 0x399   :  { %1577 = vmatprep.mubr.bf16.mxu1 %v1240_v10 }
 0x39a   :  { %1578 = vmatmul.mubr.bf16.vlgmr.msra.gmra.mrb[16].mxu1 %v1239_v30 }
 0x44d   :  { %v1789_v13 = vpop.f32.mrb[12].mxu1 }
 0x44e   :  { %v1790_v15 = vpop.f32.mrb[13].mxu1 }
 0x44f   :  { %v1791_v16 = vadd.f32 %v1790_v15, %v1789_v13  ;;  %v1792_v17 = vpop.f32.mrb[14].mxu1 }
 0x450   :  { %v1793_v18 = vpop.f32.mrb[15].mxu1 }
 0x451   :  { %v1794_v19 = vadd.f32 %v1793_v18, %v1792_v17  ;;  %v1539_v23 = vadd.f32 %v1791_v16, %v1740_v20 }
 0x453   :  { %v1542_v28 = vadd.f32 %v1794_v19, %v1740_v20 }
 0x46d   :  { %v1811_v21 = vpop.f32.mrb[16].mxu1 }
 0x46e   :  { %v1812_v22 = vpop.f32.mrb[17].mxu1 }
 0x46f   :  { %v1813_v24 = vadd.f32 %v1812_v22, %v1811_v21  ;;  %v1814_v25 = vpop.f32.mrb[18].mxu1 }
 0x470   :  { %v1815_v26 = vpop.f32.mrb[19].mxu1 }
 0x471   :  { %v1580_v29 = vadd.f32 %v1813_v24, %v1539_v23  ;;  %v1816_v31 = vadd.f32 %v1815_v26, %v1814_v25 }
 0x473   :  { %1586 = vst [vmem:[#allocation13] sm:$0xff] %v1580_v29  ;;  %v1583_v32 = vadd.f32 %v1816_v31, %v1542_v28 }
 0x475   :  { %1587 = vst [vmem:[#allocation13 + $0x18] sm:$0xff] %v1583_v32 }
 0x476   :  { %2212 = shalt.err (!%p2209_p10)
}
 0x477   :  { %s2213_s12 = scalar_lea.hbm %s2468_s10, 768 }
 0x478   :  { %p2214_p11 = scmp.ne.s32.totalorder %s2468_s10, %s2213_s12  ;;  %p2217_p12 = scmp.lt.u32.totalorder %s2213_s12, %s2468_s10 }
 0x47a   :  { %p2219_p13 = pnand %p2217_p12, %p2214_p11 }
 0x47c   :  { %2222 = shalt.err (!%p2219_p13)
}
 0x47d   :  { %s2247_s17 = smov 384   ;;  %s2248_s18 = smov 24  }
 0x47e   :  { %1603 = dma.vmem_to_hbm [thread:$0]  %s1598_s11, 768, %s2468_s10, [#allocation4], %s2247_s17, %s2247_s17, %s2248_s18  }
 0x47f   :  { %2231 = dma.done.wait [#allocation4], 768  }
 0x480   :  { %2232 = vsyncadd [#allocation4], 4294966528 }
 0x481   :  { %1607 = vsyncpa [#allocation3], 1 }
 0x482   :  { %1608 = vsyncpa [#allocation6], 1 }
 0x483   :  { %1609 = vsyncpa [#allocation9], 1 }
 0x484   :  { %1610 = vsyncpa [#allocation12], 1 }
 0x485   :  { %1611 = vsyncpa [#allocation4], 1 }

</bundles_post_ra>
